<compile_context>
chip_gen: v5e
topology: v5e:2x2
jax: 0.10.0
libtpu: 0.0.40
codegen_flags: <defaults>
</compile_context>

<pallas_src>
import jax
import jax.numpy as jnp
from jax.experimental import pallas as pl
from jax.experimental.pallas import tpu as pltpu

Z_DIM = 20
IN_DIM = 784
HID_DIM = 300
HEAD_DIM = 2 * Z_DIM          # fused [mu | logvar] columns
DEFAULT_TB = 1024             # max batch-tile rows (amortizes per-step cost)


def _round_up(v, m):
    return ((v + m - 1) // m) * m


def _choose_tb(batch, max_tb=DEFAULT_TB):
    """Batch tile: multiple of 8 (or == batch), <1 tile of pad waste,
    and >=2 grid steps when possible so v7x's two TensorCores both work."""
    if batch <= 8:
        return batch                         # single full-batch block
    n_steps = max(2, pl.cdiv(batch, max_tb))
    tb = _round_up(pl.cdiv(batch, n_steps), 8)
    return min(tb, _round_up(batch, 8))


def q_z0_kernel(x_ref, w1_ref, b1_ref, wh_ref, bh_ref, out_ref):
    # Cast x to bf16 in-kernel (no extra HBM pass); bf16 MXU matmul with f32
    # accumulation -> VPU bias add -> EUP tanh.
    x = x_ref[...].astype(jnp.bfloat16)
    h1 = jnp.tanh(
        jnp.dot(x, w1_ref[...], preferred_element_type=jnp.float32)
        + b1_ref[...]
    )
    # Fused heads: one 300 -> 40 matmul; columns [:Z_DIM]=mu, [Z_DIM:]=logvar.
    out_ref[...] = (
        jnp.dot(h1.astype(wh_ref.dtype), wh_ref[...],
                preferred_element_type=jnp.float32)
        + bh_ref[...]
    ).astype(out_ref.dtype)


def q_z0_forward(x, packed_params, *, max_tb=DEFAULT_TB):
    """x: (..., 784)-reshapeable float array. Returns (mu, logvar), (B, 20) f32."""
    w1, b1, wh, bh = packed_params
    x = x.reshape(-1, IN_DIM)                # mirrors x.view(-1, 784)
    B = x.shape[0]

    TB = _choose_tb(B, max_tb)
    grid = (pl.cdiv(B, TB),)                 # partial final block is masked

    out = pl.pallas_call(
        q_z0_kernel,
        out_shape=jax.ShapeDtypeStruct((B, HEAD_DIM), jnp.float32),
        grid=grid,
        in_specs=[
            pl.BlockSpec((TB, IN_DIM), lambda i: (i, 0)),         # x tile
            pl.BlockSpec((IN_DIM, HID_DIM), lambda i: (0, 0)),    # w1 (resident)
            pl.BlockSpec((1, HID_DIM), lambda i: (0, 0)),         # b1 (resident)
            pl.BlockSpec((HID_DIM, HEAD_DIM), lambda i: (0, 0)),  # wh (resident)
            pl.BlockSpec((1, HEAD_DIM), lambda i: (0, 0)),        # bh (resident)
        ],
        out_specs=pl.BlockSpec((TB, HEAD_DIM), lambda i: (i, 0)),
        compiler_params=pltpu.CompilerParams(
            dimension_semantics=("parallel",),
            vmem_limit_bytes=32 * 1024 * 1024),
    )(x, w1, b1, wh, bh)

    mu = out[:, :Z_DIM]
    logvar = out[:, Z_DIM:]
    return mu, logvar


def init_params(key):
    """PyTorch-like uniform fan-in init; weights stored (in, out) so x @ W."""
    k1, k2, k3, k4, k5, k6 = jax.random.split(key, 6)

    def lin(kw, kb, fan_in, fan_out):
        bound = 1.0 / (fan_in ** 0.5)
        w = jax.random.uniform(kw, (fan_in, fan_out), jnp.float32, -bound, bound)
        b = jax.random.uniform(kb, (1, fan_out), jnp.float32, -bound, bound)
        return w, b

    w1, b1 = lin(k1, k2, IN_DIM, HID_DIM)
    w31, b31 = lin(k3, k4, HID_DIM, Z_DIM)   # logvar head (fc31)
    w32, b32 = lin(k5, k6, HID_DIM, Z_DIM)   # mu head     (fc32)
    return (w1, b1, w31, b31, w32, b32)


def pack_params(params):
    """Fuse the two heads into one (300, 40) weight; weights to bf16."""
    w1, b1, w31, b31, w32, b32 = params
    wh = jnp.concatenate([w32, w31], axis=1)   # columns: [mu | logvar]
    bh = jnp.concatenate([b32, b31], axis=1)
    return (w1.astype(jnp.bfloat16), b1, wh.astype(jnp.bfloat16), bh)


def q_z0_reference_fp32(x, params):
    """Pure-JAX fp32 reference (original PyTorch-fidelity math)."""
    w1, b1, w31, b31, w32, b32 = params
    x = x.reshape(-1, IN_DIM)
    h1 = jnp.tanh(x @ w1 + b1)
    logvar = h1 @ w31 + b31
    mu = h1 @ w32 + b32
    return mu, logvar


def q_z0_reference_bf16(x, packed_params):
    """Pure-JAX reference mirroring the kernel's bf16/f32-acc numerics."""
    w1, b1, wh, bh = packed_params
    xb = x.reshape(-1, IN_DIM).astype(jnp.bfloat16)
    h1 = jnp.tanh(jnp.dot(xb, w1, preferred_element_type=jnp.float32) + b1)
    out = (jnp.dot(h1.astype(jnp.bfloat16), wh,
                   preferred_element_type=jnp.float32) + bh)
    return out[:, :Z_DIM], out[:, Z_DIM:]


def _check(mu, logvar, x, params, packed):
    mu_b, logvar_b = q_z0_reference_bf16(x, packed)
    assert jnp.allclose(mu, mu_b, atol=5e-3, rtol=5e-3)
    assert jnp.allclose(logvar, logvar_b, atol=5e-3, rtol=5e-3)
    mu_f, logvar_f = q_z0_reference_fp32(x, params)
    assert jnp.allclose(mu, mu_f, atol=6e-2, rtol=6e-2)
    assert jnp.allclose(logvar, logvar_f, atol=6e-2, rtol=6e-2)


if __name__ == "__main__":
    key = jax.random.PRNGKey(0)
    kp, kx = jax.random.split(key)

    params = init_params(kp)
    packed = pack_params(params)

    # Small "MNIST-like" batch: 2 images of 1x28x28 (mirrors x.view(-1, 784)).
    B = 2
    x_img = jax.random.uniform(kx, (B, 1, 28, 28), jnp.float32)
    mu, logvar = q_z0_forward(x_img, packed)
    mu = jax.block_until_ready(mu)
    logvar = jax.block_until_ready(logvar)
    assert mu.shape == (B, Z_DIM) and logvar.shape == (B, Z_DIM)
    _check(mu, logvar, x_img, params, packed)

    # Partial-final-block path: B=12 -> TB=8, grid=(2,), last block 4 rows.
    B2 = 12
    x2 = jax.random.uniform(jax.random.PRNGKey(1), (B2, IN_DIM), jnp.float32)
    mu2, logvar2 = q_z0_forward(x2, packed)
    mu2 = jax.block_until_ready(mu2)
    logvar2 = jax.block_until_ready(logvar2)
    assert mu2.shape == (B2, Z_DIM) and logvar2.shape == (B2, Z_DIM)
    _check(mu2, logvar2, x2, params, packed)

    # Adaptive-tile / multi-step grid path: B=1040 -> TB=520, grid=(2,), no pad.
    B3 = 1040
    x3 = jax.random.uniform(jax.random.PRNGKey(2), (B3, IN_DIM), jnp.float32)
    mu3, logvar3 = q_z0_forward(x3, packed)
    mu3 = jax.block_until_ready(mu3)
    logvar3 = jax.block_until_ready(logvar3)
    assert mu3.shape == (B3, Z_DIM) and logvar3.shape == (B3, Z_DIM)
    _check(mu3, logvar3, x3, params, packed)

    print("KERNEL_OK")
</pallas_src>

<mosaic_0001>
module attributes {stable_mosaic.version = 11 : i64} {
  func.func @q_z0_kernel(%arg0: i32, %arg1: memref<2x784xf32, #tpu.memory_space<vmem>>, %arg2: memref<784x300xbf16, #tpu.memory_space<vmem>>, %arg3: memref<1x300xf32, #tpu.memory_space<vmem>>, %arg4: memref<300x40xbf16, #tpu.memory_space<vmem>>, %arg5: memref<1x40xf32, #tpu.memory_space<vmem>>, %arg6: memref<2x40xf32, #tpu.memory_space<vmem>>) attributes {dimension_semantics = [#tpu.dimension_semantics<parallel>], iteration_bounds = array<i64: 1>, scalar_prefetch = 0 : i64, scratch_operands = 0 : i64, tpu.core_type = #tpu.core_type<tc>, window_params = [{transform_indices = @transform_0, window_bounds = array<i64: 2, 784>}, {pipeline_mode = #tpu.pipeline_mode<synchronous>, transform_indices = @transform_1, window_bounds = array<i64: 784, 300>}, {pipeline_mode = #tpu.pipeline_mode<synchronous>, transform_indices = @transform_2, window_bounds = array<i64: 1, 300>}, {pipeline_mode = #tpu.pipeline_mode<synchronous>, transform_indices = @transform_3, window_bounds = array<i64: 300, 40>}, {pipeline_mode = #tpu.pipeline_mode<synchronous>, transform_indices = @transform_4, window_bounds = array<i64: 1, 40>}, {transform_indices = @transform_5, window_bounds = array<i64: 2, 40>}]} {
    %c0 = arith.constant 0 : index
    %c0_0 = arith.constant 0 : index
    %0 = vector.load %arg1[%c0, %c0_0] : memref<2x784xf32, #tpu.memory_space<vmem>>, vector<2x784xf32>
    %1 = arith.truncf %0 : vector<2x784xf32> to vector<2x784xbf16>
    %c0_1 = arith.constant 0 : index
    %c0_2 = arith.constant 0 : index
    %2 = vector.load %arg2[%c0_1, %c0_2] : memref<784x300xbf16, #tpu.memory_space<vmem>>, vector<784x300xbf16>
    %cst = arith.constant dense<0.000000e+00> : vector<2x300xf32>
    %3 = tpu.matmul %1, %2, %cst {dimension_numbers = #tpu.dot_dimension_numbers<[1], [0], [0], [1], [0, 0, 1, 1], [], []>} : vector<2x784xbf16>, vector<784x300xbf16>, vector<2x300xf32> -> vector<2x300xf32>
    %c0_3 = arith.constant 0 : index
    %c0_4 = arith.constant 0 : index
    %4 = vector.load %arg3[%c0_3, %c0_4] : memref<1x300xf32, #tpu.memory_space<vmem>>, vector<1x300xf32>
    %5 = vector.broadcast %4 : vector<1x300xf32> to vector<2x300xf32>
    %6 = arith.addf %3, %5 : vector<2x300xf32>
    %7 = math.tanh %6 : vector<2x300xf32>
    %8 = arith.truncf %7 : vector<2x300xf32> to vector<2x300xbf16>
    %c0_5 = arith.constant 0 : index
    %c0_6 = arith.constant 0 : index
    %9 = vector.load %arg4[%c0_5, %c0_6] : memref<300x40xbf16, #tpu.memory_space<vmem>>, vector<300x40xbf16>
    %cst_7 = arith.constant dense<0.000000e+00> : vector<2x40xf32>
    %10 = tpu.matmul %8, %9, %cst_7 {dimension_numbers = #tpu.dot_dimension_numbers<[1], [0], [0], [1], [0, 0, 1, 1], [], []>} : vector<2x300xbf16>, vector<300x40xbf16>, vector<2x40xf32> -> vector<2x40xf32>
    %c0_8 = arith.constant 0 : index
    %c0_9 = arith.constant 0 : index
    %11 = vector.load %arg5[%c0_8, %c0_9] : memref<1x40xf32, #tpu.memory_space<vmem>>, vector<1x40xf32>
    %12 = vector.broadcast %11 : vector<1x40xf32> to vector<2x40xf32>
    %13 = arith.addf %10, %12 : vector<2x40xf32>
    %c0_10 = arith.constant 0 : index
    %c0_11 = arith.constant 0 : index
    %14 = vector.load %arg6[%c0_10, %c0_11] : memref<2x40xf32, #tpu.memory_space<vmem>>, vector<2x40xf32>
    tpu.vector_store %arg6[%c0_10, %c0_11], %13 {strides = array<i32>} : memref<2x40xf32, #tpu.memory_space<vmem>>, vector<2x40xf32>,
    return
  }
  func.func @transform_0(%arg0: i32) -> (i32, i32) {
    %c0_i32 = arith.constant 0 : i32
    %c0_i32_0 = arith.constant 0 : i32
    return %arg0, %c0_i32 : i32, i32
  }
  func.func @transform_1(%arg0: i32) -> (i32, i32) {
    %c0_i32 = arith.constant 0 : i32
    %c0_i32_0 = arith.constant 0 : i32
    %c0_i32_1 = arith.constant 0 : i32
    return %c0_i32, %c0_i32_0 : i32, i32
  }
  func.func @transform_2(%arg0: i32) -> (i32, i32) {
    %c0_i32 = arith.constant 0 : i32
    %c0_i32_0 = arith.constant 0 : i32
    %c0_i32_1 = arith.constant 0 : i32
    return %c0_i32, %c0_i32_0 : i32, i32
  }
  func.func @transform_3(%arg0: i32) -> (i32, i32) {
    %c0_i32 = arith.constant 0 : i32
    %c0_i32_0 = arith.constant 0 : i32
    %c0_i32_1 = arith.constant 0 : i32
    return %c0_i32, %c0_i32_0 : i32, i32
  }
  func.func @transform_4(%arg0: i32) -> (i32, i32) {
    %c0_i32 = arith.constant 0 : i32
    %c0_i32_0 = arith.constant 0 : i32
    %c0_i32_1 = arith.constant 0 : i32
    return %c0_i32, %c0_i32_0 : i32, i32
  }
  func.func @transform_5(%arg0: i32) -> (i32, i32) {
    %c0_i32 = arith.constant 0 : i32
    %c0_i32_0 = arith.constant 0 : i32
    return %arg0, %c0_i32 : i32, i32
  }
}

</mosaic_0001>

<bundles_post_ra>
// kernel: tpu_custom_call.1
= control target key start
LH: loop header
LB: loop body
LE: loop exit
PB: predicated region body
PF: predicated region fallthrough
CT: control target
= control target key end

     0   :  { %vm1038_vm0 = vcmask 130048   ;;  %s3440_s0 = inlined_call_operand.vmem [shape: f32[2,784], index: 0, kind: input, shape index: {}]   ;;  %s3441_s1 = inlined_call_operand.vmem [shape: bf16[784,300], index: 1, kind: input, shape index: {}]   ;;  %s3442_s2 = inlined_call_operand.vmem [shape: f32[1,300], index: 2, kind: input, shape index: {}]   ;;  %s3443_s3 = inlined_call_operand.vmem [shape: bf16[300,40], index: 3, kind: input, shape index: {}]   ;;  %s3444_s4 = inlined_call_operand.vmem [shape: f32[1,40], index: 4, kind: input, shape index: {}]   ;;  %s3445_s5 = inlined_call_operand.hbm [shape: f32[2,40], index: 5, kind: output, shape index: {}]  }
   0x1   :  { %v1627_v0 = vld [vmem:[%s3441_s1 + $0xa8] sm:$0xf]  ;;  %v2231_v1 = vld [vmem:[%s3441_s1 + $0xb0] sm:$0xf0]  ;;  %v1615_v11 = vld [vmem:[%s3441_s1 + $0x90] sm:$0xf] }
   0x2   :  { %v1723_v2 = vld [vmem:[%s3441_s1 + $0x168] sm:$0xf]  ;;  %v1628_v3 = vor.u32 %v2231_v1, %v1627_v0  ;;  %v2255_v4 = vld [vmem:[%s3441_s1 + $0x170] sm:$0xf0]  ;;  %v2228_v13 = vld [vmem:[%s3441_s1 + $0x98] sm:$0xf0] }
   0x3   :  { %v1819_v5 = vld [vmem:[%s3441_s1 + $0x228] sm:$0xf]  ;;  %v2279_v6 = vld [vmem:[%s3441_s1 + $0x230] sm:$0xf0]  ;;  %v1724_v7 = vor.u32 %v2255_v4, %v1723_v2  ;;  %v1711_v14 = vld [vmem:[%s3441_s1 + $0x150] sm:$0xf]  ;;  %v1616_v16 = vor.u32 %v2228_v13, %v1615_v11 }
   0x4   :  { %v1820_v8 = vor.u32 %v2279_v6, %v1819_v5  ;;  %v1915_v9 = vld [vmem:[%s3441_s1 + $0x2e8] sm:$0xf]  ;;  %v2303_v10 = vld [vmem:[%s3441_s1 + $0x2f0] sm:$0xf0]  ;;  %1042 = vmatpush.bf16.msra.mxu0 %v1628_v3  ;;  %v2252_v15 = vld [vmem:[%s3441_s1 + $0x158] sm:$0xf0] }
   0x5   :  { %v1916_v12 = vor.u32 %v2303_v10, %v1915_v9  ;;  %1055 = vmatpush.bf16.msra.mxu1 %v1724_v7  ;;  %v1712_v17 = vor.u32 %v2252_v15, %v1711_v14  ;;  %v1807_v18 = vld [vmem:[%s3441_s1 + $0x210] sm:$0xf]  ;;  %v2276_v19 = vld [vmem:[%s3441_s1 + $0x218] sm:$0xf0]  ;;  %v1603_v23 = vld [vmem:[%s3441_s1 + $0x78] sm:$0xf] }
   0x6   :  { %1068 = vmatpush.bf16.msra.mxu2 %v1820_v8  ;;  %v1903_v20 = vld [vmem:[%s3441_s1 + $0x2d0] sm:$0xf]  ;;  %v1808_v21 = vor.u32 %v2276_v19, %v1807_v18  ;;  %v2300_v22 = vld [vmem:[%s3441_s1 + $0x2d8] sm:$0xf0]  ;;  %v2225_v24 = vld [vmem:[%s3441_s1 + $0x80] sm:$0xf0] }
   0x7   :  { %1081 = vmatpush.bf16.msra.mxu3 %v1916_v12  ;;  %v1904_v25 = vor.u32 %v2300_v22, %v1903_v20  ;;  %v1699_v26 = vld [vmem:[%s3441_s1 + $0x138] sm:$0xf]  ;;  %v2249_v27 = vld [vmem:[%s3441_s1 + $0x140] sm:$0xf0]  ;;  %v1604_v29 = vor.u32 %v2225_v24, %v1603_v23  ;;  %v1591_v35 = vld [vmem:[%s3441_s1 + $0x60] sm:$0xf] }
   0x8   :  { %v1795_v28 = vld [vmem:[%s3441_s1 + $0x1f8] sm:$0xf]  ;;  %1043 = vmatpush.bf16.msra.mxu0 %v1616_v16  ;;  %v2273_v30 = vld [vmem:[%s3441_s1 + $0x200] sm:$0xf0]  ;;  %v1700_v33 = vor.u32 %v2249_v27, %v1699_v26  ;;  %v2222_v36 = vld [vmem:[%s3441_s1 + $0x68] sm:$0xf0] }
   0x9   :  { %v1891_v31 = vld [vmem:[%s3441_s1 + $0x2b8] sm:$0xf]  ;;  %v2297_v32 = vld [vmem:[%s3441_s1 + $0x2c0] sm:$0xf0]  ;;  %1056 = vmatpush.bf16.msra.mxu1 %v1712_v17  ;;  %v1796_v34 = vor.u32 %v2273_v30, %v1795_v28  ;;  %v1687_v37 = vld [vmem:[%s3441_s1 + $0x120] sm:$0xf]  ;;  %v1592_v44 = vor.u32 %v2222_v36, %v1591_v35 }
   0xa   :  { %1069 = vmatpush.bf16.msra.mxu2 %v1808_v21  ;;  %v1892_v38 = vor.u32 %v2297_v32, %v1891_v31  ;;  %v2246_v39 = vld [vmem:[%s3441_s1 + $0x128] sm:$0xf0]  ;;  %v1783_v40 = vld [vmem:[%s3441_s1 + $0x1e0] sm:$0xf]  ;;  %v1579_v47 = vld [vmem:[%s3441_s1 + $0x48] sm:$0xf] }
   0xb   :  { %1082 = vmatpush.bf16.msra.mxu3 %v1904_v25  ;;  %v2270_v41 = vld [vmem:[%s3441_s1 + $0x1e8] sm:$0xf0]  ;;  %v1879_v42 = vld [vmem:[%s3441_s1 + $0x2a0] sm:$0xf]  ;;  %v1688_v45 = vor.u32 %v2246_v39, %v1687_v37  ;;  %v2219_v48 = vld [vmem:[%s3441_s1 + $0x50] sm:$0xf0] }
   0xc   :  { %v2294_v43 = vld [vmem:[%s3441_s1 + $0x2a8] sm:$0xf0]  ;;  %1044 = vmatpush.bf16.msra.mxu0 %v1604_v29  ;;  %v1784_v46 = vor.u32 %v2270_v41, %v1783_v40  ;;  %v1675_v49 = vld [vmem:[%s3441_s1 + $0x108] sm:$0xf]  ;;  %v2243_v51 = vld [vmem:[%s3441_s1 + $0x110] sm:$0xf0]  ;;  %v1580_v56 = vor.u32 %v2219_v48, %v1579_v47 }
   0xd   :  { %1057 = vmatpush.bf16.msra.mxu1 %v1700_v33  ;;  %v1880_v50 = vor.u32 %v2294_v43, %v1879_v42  ;;  %v1771_v52 = vld [vmem:[%s3441_s1 + $0x1c8] sm:$0xf]  ;;  %v2267_v53 = vld [vmem:[%s3441_s1 + $0x1d0] sm:$0xf0]  ;;  %v1676_v57 = vor.u32 %v2243_v51, %v1675_v49  ;;  %v1567_v59 = vld [vmem:[%s3441_s1 + $0x30] sm:$0xf] }
   0xe   :  { %1070 = vmatpush.bf16.msra.mxu2 %v1796_v34  ;;  %v1867_v54 = vld [vmem:[%s3441_s1 + $0x288] sm:$0xf]  ;;  %v2291_v55 = vld [vmem:[%s3441_s1 + $0x290] sm:$0xf0]  ;;  %v1772_v58 = vor.u32 %v2267_v53, %v1771_v52  ;;  %v2216_v60 = vld [vmem:[%s3441_s1 + $0x38] sm:$0xf0] }
   0xf   :  { %1083 = vmatpush.bf16.msra.mxu3 %v1892_v38  ;;  %v1663_v61 = vld [vmem:[%s3441_s1 + $0xf0] sm:$0xf]  ;;  %v1868_v62 = vor.u32 %v2291_v55, %v1867_v54  ;;  %v2240_v63 = vld [vmem:[%s3441_s1 + $0xf8] sm:$0xf0]  ;;  %v1568_v4 = vor.u32 %v2216_v60, %v1567_v59  ;;  %v1555_v7 = vld [vmem:[%s3441_s1 + $0x18] sm:$0xf] }
  0x10   :  { %1045 = vmatpush.bf16.msra.mxu0 %v1592_v44  ;;  %v1759_v0 = vld [vmem:[%s3441_s1 + $0x1b0] sm:$0xf]  ;;  %v2264_v1 = vld [vmem:[%s3441_s1 + $0x1b8] sm:$0xf0]  ;;  %v1664_v5 = vor.u32 %v2240_v63, %v1663_v61  ;;  %v2213_v8 = vld [vmem:[%s3441_s1 + $0x20] sm:$0xf0] }
  0x11   :  { %1058 = vmatpush.bf16.msra.mxu1 %v1688_v45  ;;  %v1855_v2 = vld [vmem:[%s3441_s1 + $0x270] sm:$0xf]  ;;  %v2288_v3 = vld [vmem:[%s3441_s1 + $0x278] sm:$0xf0]  ;;  %v1760_v6 = vor.u32 %v2264_v1, %v1759_v0  ;;  %v1651_v9 = vld [vmem:[%s3441_s1 + $0xd8] sm:$0xf]  ;;  %v1556_v17 = vor.u32 %v2213_v8, %v1555_v7 }
  0x12   :  { %1071 = vmatpush.bf16.msra.mxu2 %v1784_v46  ;;  %v1856_v10 = vor.u32 %v2288_v3, %v1855_v2  ;;  %v2237_v11 = vld [vmem:[%s3441_s1 + $0xe0] sm:$0xf0]  ;;  %v1747_v12 = vld [vmem:[%s3441_s1 + $0x198] sm:$0xf]  ;;  %v1543_v16 = vld [vmem:[%s3441_s1] sm:$0xf] }
  0x13   :  { %1084 = vmatpush.bf16.msra.mxu3 %v1880_v50  ;;  %v2261_v13 = vld [vmem:[%s3441_s1 + $0x1a0] sm:$0xf0]  ;;  %v1843_v14 = vld [vmem:[%s3441_s1 + $0x258] sm:$0xf]  ;;  %v2210_v18 = vld [vmem:[%s3441_s1 + $0x8] sm:$0xf0]  ;;  %v1652_v21 = vor.u32 %v2237_v11, %v1651_v9 }
  0x14   :  { %1046 = vmatpush.bf16.msra.mxu0 %v1580_v56  ;;  %v2285_v15 = vld [vmem:[%s3441_s1 + $0x260] sm:$0xf0]  ;;  %v1639_v19 = vld [vmem:[%s3441_s1 + $0xc0] sm:$0xf]  ;;  %v2234_v20 = vld [vmem:[%s3441_s1 + $0xc8] sm:$0xf0]  ;;  %v1748_v22 = vor.u32 %v2261_v13, %v1747_v12  ;;  %v1544_v32 = vor.u32 %v2210_v18, %v1543_v16 }
  0x15   :  { %1059 = vmatpush.bf16.msra.mxu1 %v1676_v57  ;;  %v1735_v23 = vld [vmem:[%s3441_s1 + $0x180] sm:$0xf]  ;;  %v2258_v24 = vld [vmem:[%s3441_s1 + $0x188] sm:$0xf0]  ;;  %v1844_v26 = vor.u32 %v2285_v15, %v1843_v14  ;;  %v2011_v29 = vld [vmem:[%s3441_s1 + $0x3a8] sm:$0xf]  ;;  %v1640_v36 = vor.u32 %v2234_v20, %v1639_v19 }
  0x16   :  { %1072 = vmatpush.bf16.msra.mxu2 %v1772_v58  ;;  %v22_v25 = vld [vmem:[%s3440_s0] sm:$0xff]  ;;  %v2282_v28 = vld [vmem:[%s3441_s1 + $0x248] sm:$0xf0]  ;;  %v2327_v30 = vld [vmem:[%s3441_s1 + $0x3b0] sm:$0xf0]  ;;  %v1736_v37 = vor.u32 %v2258_v24, %v1735_v23 }
  0x17   :  { %1085 = vmatpush.bf16.msra.mxu3 %v1868_v62  ;;  %v1831_v27 = vld [vmem:[%s3441_s1 + $0x240] sm:$0xf]  ;;  %26 = vst [vmem:[#allocation1] ss:$4 sm:$0xff] %v22_v25  ;;  %v2107_v31 = vld [vmem:[%s3441_s1 + $0x468] sm:$0xf]  ;;  %v2012_v41 = vor.u32 %v2327_v30, %v2011_v29 }
  0x18   :  { %1047 = vmatpush.bf16.msra.mxu0 %v1568_v4  ;;  %v2351_v33 = vld [vmem:[%s3441_s1 + $0x470] sm:$0xf0]  ;;  %v2230_v34 = vld [vmem:[%s3441_s1 + $0xac] sm:$0xf]  ;;  %v1629_v35 = vld [vmem:[%s3441_s1 + $0xb4] sm:$0xf0]  ;;  %v1832_v40 = vor.u32 %v2282_v28, %v1831_v27 }
  0x19   :  { %1060 = vmatpush.bf16.msra.mxu1 %v1664_v5  ;;  %v2119_v38 = vld [vmem:[%s3441_s1 + $0x480] sm:$0xf]  ;;  %v2354_v39 = vld [vmem:[%s3441_s1 + $0x488] sm:$0xf0]  ;;  %v1725_v43 = vld [vmem:[%s3441_s1 + $0x174] sm:$0xf0]  ;;  %v2108_v44 = vor.u32 %v2351_v33, %v2107_v31  ;;  %v1632_v45 = vor.u32 %v2230_v34, %v1629_v35 }
  0x1a   :  { %1073 = vmatpush.bf16.msra.mxu2 %v1760_v6  ;;  %v2254_v42 = vld [vmem:[%s3441_s1 + $0x16c] sm:$0xf]  ;;  %v1999_v46 = vld [vmem:[%s3441_s1 + $0x390] sm:$0xf]  ;;  %v2324_v47 = vld [vmem:[%s3441_s1 + $0x398] sm:$0xf0]  ;;  %v2120_v49 = vor.u32 %v2354_v39, %v2119_v38 }
  0x1b   :  { %1086 = vmatpush.bf16.msra.mxu3 %v1856_v10  ;;  %v2095_v48 = vld [vmem:[%s3441_s1 + $0x450] sm:$0xf]  ;;  %v2348_v50 = vld [vmem:[%s3441_s1 + $0x458] sm:$0xf0]  ;;  %v2227_v51 = vld [vmem:[%s3441_s1 + $0x94] sm:$0xf]  ;;  %v1728_v56 = vor.u32 %v2254_v42, %v1725_v43  ;;  %v2000_v57 = vor.u32 %v2324_v47, %v1999_v46 }
  0x1c   :  { %1048 = vmatpush.bf16.msra.mxu0 %v1556_v17  ;;  %v1617_v52 = vld [vmem:[%s3441_s1 + $0x9c] sm:$0xf0]  ;;  %v2251_v54 = vld [vmem:[%s3441_s1 + $0x154] sm:$0xf]  ;;  %v2096_v60 = vor.u32 %v2348_v50, %v2095_v48  ;;  %v1987_v62 = vld [vmem:[%s3441_s1 + $0x378] sm:$0xf] }
  0x1d   :  { %1061 = vmatpush.bf16.msra.mxu1 %v1652_v21  ;;  %v1713_v58 = vld [vmem:[%s3441_s1 + $0x15c] sm:$0xf0]  ;;  %v1620_v61 = vor.u32 %v2227_v51, %v1617_v52  ;;  %v2321_v63 = vld [vmem:[%s3441_s1 + $0x380] sm:$0xf0]  ;;  %v2083_v0 = vld [vmem:[%s3441_s1 + $0x438] sm:$0xf] }
  0x1e   :  { %1074 = vmatpush.bf16.msra.mxu2 %v1748_v22  ;;  %v31_v53 = vld.sshfl [vmem:[#allocation1 + $0x10] sm:$0xff pattern:$0x73625140]  ;;  %v29_v59 = vld.sshfl [vmem:[#allocation1] sm:$0xff pattern:$0x73625140]  ;;  %v1716_v6 = vor.u32 %v2251_v54, %v1713_v58  ;;  %v1988_v7 = vor.u32 %v2321_v63, %v1987_v62 }
  0x1f   :  { %1087 = vmatpush.bf16.msra.mxu3 %v1844_v26  ;;  %v2686_v55 = vpack.c.bf16 %v31_v53, %v31_v53  ;;  %v2700_v1 = vpack.c.bf16 %v29_v59, %v29_v59  ;;  %v2345_v2 = vld [vmem:[%s3441_s1 + $0x440] sm:$0xf0]  ;;  %v2224_v3 = vld [vmem:[%s3441_s1 + $0x7c] sm:$0xf]  ;;  %v1605_v4 = vld [vmem:[%s3441_s1 + $0x84] sm:$0xf0] }
  0x20   :  { %1049 = vmatpush.bf16.msra.mxu0 %v1544_v32  ;;  %v2248_v5 = vld [vmem:[%s3441_s1 + $0x13c] sm:$0xf]  ;;  %v1701_v8 = vld [vmem:[%s3441_s1 + $0x144] sm:$0xf0]  ;;  %v2084_v10 = vor.u32 %v2345_v2, %v2083_v0  ;;  %v1608_v11 = vor.u32 %v2224_v3, %v1605_v4  ;;  %v1975_v12 = vld [vmem:[%s3441_s1 + $0x360] sm:$0xf] }
  0x21   :  { %1062 = vmatpush.bf16.msra.mxu1 %v1640_v36  ;;  %v30_v9 = vld.sshfl [vmem:[#allocation1 + $0x8] sm:$0xff pattern:$0x73625140]  ;;  %v2071_v14 = vld [vmem:[%s3441_s1 + $0x420] sm:$0xf]  ;;  %v1704_v20 = vor.u32 %v2248_v5, %v1701_v8 }
  0x22   :  { %1075 = vmatpush.bf16.msra.mxu2 %v1736_v37  ;;  %v2318_v13 = vld [vmem:[%s3441_s1 + $0x368] sm:$0xf0]  ;;  %v2728_v15 = vpack.c.bf16 %v30_v9, %v30_v9  ;;  %v2221_v17 = vld [vmem:[%s3441_s1 + $0x64] sm:$0xf]  ;;  %v1593_v18 = vld [vmem:[%s3441_s1 + $0x6c] sm:$0xf0] }
  0x23   :  { %1088 = vmatpush.bf16.msra.mxu3 %v1832_v40  ;;  %1050 = vmatmul.bf16.vlgmr.msra.gmra.mxu0 %v2700_v1  ;;  %v2342_v16 = vld [vmem:[%s3441_s1 + $0x428] sm:$0xf0]  ;;  %v32_v19 = vld.sshfl [vmem:[#allocation1 + $0x18] sm:$0xff pattern:$0x73625140]  ;;  %v1976_v21 = vor.u32 %v2318_v13, %v1975_v12  ;;  %v1596_v26 = vor.u32 %v2221_v17, %v1593_v18 }
  0x24   :  { %1094 = vmatpush.bf16.msrb.mxu0 %v2012_v41  ;;  %1063 = vmatmul.bf16.vlgmr.msra.gmra.mxu1 %v2728_v15  ;;  %v2245_v22 = vld [vmem:[%s3441_s1 + $0x124] sm:$0xf]  ;;  %v1689_v23 = vld [vmem:[%s3441_s1 + $0x12c] sm:$0xf0]  ;;  %v2746_v24 = vpack.c.bf16 %v32_v19, %v32_v19  ;;  %v2072_v25 = vor.u32 %v2342_v16, %v2071_v14  ;;  %v1963_v27 = vld [vmem:[%s3441_s1 + $0x348] sm:$0xf] }
  0x25   :  { %1107 = vmatpush.bf16.msrb.mxu1 %v2108_v44  ;;  %1076 = vmatmul.bf16.vlgmr.msra.gmra.mxu2 %v2686_v55  ;;  %v2315_v28 = vld [vmem:[%s3441_s1 + $0x350] sm:$0xf0]  ;;  %v2059_v29 = vld [vmem:[%s3441_s1 + $0x408] sm:$0xf]  ;;  %v2218_v31 = vld [vmem:[%s3441_s1 + $0x4c] sm:$0xf]  ;;  %v1692_v34 = vor.u32 %v2245_v22, %v1689_v23 }
  0x26   :  { %1127 = vmatpush.bf16.msrb.mxu2 %v2120_v49  ;;  %v2339_v30 = vld [vmem:[%s3441_s1 + $0x410] sm:$0xf0]  ;;  %v1581_v32 = vld [vmem:[%s3441_s1 + $0x54] sm:$0xf0]  ;;  %1089 = vmatmul.bf16.vlgmr.msra.gmra.mxu3 %v2746_v24  ;;  %v2242_v33 = vld [vmem:[%s3441_s1 + $0x10c] sm:$0xf]  ;;  %v1964_v35 = vor.u32 %v2315_v28, %v1963_v27 }
  0x27   :  { %1133 = vmatpush.bf16.msrb.mxu3 %v1632_v45  ;;  %v1677_v36 = vld [vmem:[%s3441_s1 + $0x114] sm:$0xf0]  ;;  %v1951_v37 = vld [vmem:[%s3441_s1 + $0x330] sm:$0xf]  ;;  %v2312_v38 = vld [vmem:[%s3441_s1 + $0x338] sm:$0xf0]  ;;  %v2060_v39 = vor.u32 %v2339_v30, %v2059_v29  ;;  %v1584_v40 = vor.u32 %v2218_v31, %v1581_v32 }
  0x28   :  { %1095 = vmatpush.bf16.msrb.mxu0 %v2000_v57  ;;  %v2047_v41 = vld [vmem:[%s3441_s1 + $0x3f0] sm:$0xf]  ;;  %v2336_v42 = vld [vmem:[%s3441_s1 + $0x3f8] sm:$0xf0]  ;;  %v23_v43 = vld [vmem:[%s3440_s0 + $0x8] sm:$0x3f]  ;;  %v1680_v46 = vor.u32 %v2242_v33, %v1677_v36  ;;  %v1952_v47 = vor.u32 %v2312_v38, %v1951_v37 }
  0x29   :  { %1108 = vmatpush.bf16.msrb.mxu1 %v2096_v60  ;;  %v2215_v44 = vld [vmem:[%s3441_s1 + $0x34] sm:$0xf]  ;;  %v1569_v45 = vld [vmem:[%s3441_s1 + $0x3c] sm:$0xf0]  ;;  %28 = vst [vmem:[#allocation1 + $0x20] ss:$4 sm:$0xff] %v23_v43  ;;  %v2048_v50 = vor.u32 %v2336_v42, %v2047_v41 }
  0x2a   :  { %1146 = vmatpush.bf16.msra.mxu2 %v1728_v56  ;;  %v2239_v48 = vld [vmem:[%s3441_s1 + $0xf4] sm:$0xf]  ;;  %v1665_v49 = vld [vmem:[%s3441_s1 + $0xfc] sm:$0xf0]  ;;  %v1572_v51 = vor.u32 %v2215_v44, %v1569_v45  ;;  %v1939_v52 = vld [vmem:[%s3441_s1 + $0x318] sm:$0xf] }
  0x2b   :  { %1134 = vmatpush.bf16.msrb.mxu3 %v1620_v61  ;;  %v2309_v53 = vld [vmem:[%s3441_s1 + $0x320] sm:$0xf0]  ;;  %v2035_v54 = vld [vmem:[%s3441_s1 + $0x3d8] sm:$0xf]  ;;  %v2212_v57 = vld [vmem:[%s3441_s1 + $0x1c] sm:$0xf]  ;;  %v1668_v63 = vor.u32 %v2239_v48, %v1665_v49 }
  0x2c   :  { %1096 = vmatpush.bf16.msrb.mxu0 %v1988_v7  ;;  %v2333_v56 = vld [vmem:[%s3441_s1 + $0x3e0] sm:$0xf0]  ;;  %v1557_v58 = vld [vmem:[%s3441_s1 + $0x24] sm:$0xf0]  ;;  %v2236_v59 = vld [vmem:[%s3441_s1 + $0xdc] sm:$0xf]  ;;  %v1940_v0 = vor.u32 %v2309_v53, %v1939_v52 }
  0x2d   :  { %1109 = vmatpush.bf16.msrb.mxu1 %v2084_v10  ;;  %v1653_v60 = vld [vmem:[%s3441_s1 + $0xe4] sm:$0xf0]  ;;  %v1927_v61 = vld [vmem:[%s3441_s1 + $0x300] sm:$0xf]  ;;  %v2306_v62 = vld [vmem:[%s3441_s1 + $0x308] sm:$0xf0]  ;;  %v2036_v5 = vor.u32 %v2333_v56, %v2035_v54 }
  0x2e   :  { %1147 = vmatpush.bf16.msra.mxu2 %v1716_v6  ;;  %v2023_v2 = vld [vmem:[%s3441_s1 + $0x3c0] sm:$0xf]  ;;  %v2330_v3 = vld [vmem:[%s3441_s1 + $0x3c8] sm:$0xf0]  ;;  %v2209_v4 = vld [vmem:[%s3441_s1 + $0x4] sm:$0xf]  ;;  %v1560_v6 = vor.u32 %v2212_v57, %v1557_v58  ;;  %v1656_v17 = vor.u32 %v2236_v59, %v1653_v60  ;;  %v1928_v18 = vor.u32 %v2306_v62, %v1927_v61 }
  0x2f   :  { %1135 = vmatpush.bf16.msrb.mxu3 %v1608_v11  ;;  %v1545_v7 = vld [vmem:[%s3441_s1 + $0xc] sm:$0xf0]  ;;  %v2278_v10 = vld [vmem:[%s3441_s1 + $0x22c] sm:$0xf]  ;;  %v1821_v11 = vld [vmem:[%s3441_s1 + $0x234] sm:$0xf0] }
  0x30   :  { %1097 = vmatpush.bf16.msrb.mxu0 %v1976_v21  ;;  %v35_v8 = vld.sshfl [vmem:[#allocation1 + $0x30] sm:$0xff pattern:$0x73625140]  ;;  %v2302_v12 = vld [vmem:[%s3441_s1 + $0x2ec] sm:$0xf]  ;;  %v2024_v21 = vor.u32 %v2330_v3, %v2023_v2  ;;  %v1548_v22 = vor.u32 %v2209_v4, %v1545_v7 }
  0x31   :  { %1110 = vmatpush.bf16.msrb.mxu1 %v2072_v25  ;;  %v2842_v9 = vpack.c.bf16 %v35_v8, %v35_v8  ;;  %v1917_v13 = vld [vmem:[%s3441_s1 + $0x2f4] sm:$0xf0]  ;;  %v2326_v14 = vld [vmem:[%s3441_s1 + $0x3ac] sm:$0xf]  ;;  %v1641_v23 = vld [vmem:[%s3441_s1 + $0xcc] sm:$0xf0] }
  0x32   :  { %1148 = vmatpush.bf16.msra.mxu2 %v1704_v20  ;;  %v2013_v16 = vld [vmem:[%s3441_s1 + $0x3b4] sm:$0xf0]  ;;  %v33_v19 = vld.sshfl [vmem:[#allocation1 + $0x20] sm:$0xff pattern:$0x73625140]  ;;  %v1920_v27 = vor.u32 %v2302_v12, %v1917_v13 }
  0x33   :  { %1136 = vmatpush.bf16.msrb.mxu3 %v1596_v26  ;;  %v2233_v20 = vld [vmem:[%s3441_s1 + $0xc4] sm:$0xf]  ;;  %v34_v25 = vld.sshfl [vmem:[#allocation1 + $0x28] sm:$0xff pattern:$0x73625140]  ;;  %v1824_v26 = vor.u32 %v2278_v10, %v1821_v11  ;;  %v2016_v31 = vor.u32 %v2326_v14, %v2013_v16  ;;  %v2879_v32 = vpack.c.bf16 %v33_v19, %v33_v19 }
  0x34   :  { %1098 = vmatpush.bf16.msrb.mxu0 %v1964_v35  ;;  %v2350_v28 = vld [vmem:[%s3441_s1 + $0x46c] sm:$0xf]  ;;  %v2109_v29 = vld [vmem:[%s3441_s1 + $0x474] sm:$0xf0]  ;;  %v2275_v30 = vld [vmem:[%s3441_s1 + $0x214] sm:$0xf]  ;;  %v1644_v36 = vor.u32 %v2233_v20, %v1641_v23  ;;  %v2890_v37 = vpack.c.bf16 %v34_v25, %v34_v25 }
  0x35   :  { %1111 = vmatpush.bf16.msrb.mxu1 %v2060_v39  ;;  %2129 = vmatmul.msk.bf16.vlgmr.msrb.gmra.mxu2 %vm1038_vm0, %v2842_v9  ;;  %v1809_v33 = vld [vmem:[%s3441_s1 + $0x21c] sm:$0xf0]  ;;  %v2323_v38 = vld [vmem:[%s3441_s1 + $0x394] sm:$0xf]  ;;  %v2272_v45 = vld [vmem:[%s3441_s1 + $0x1fc] sm:$0xf] }
  0x36   :  { %1149 = vmatpush.bf16.msra.mxu2 %v1692_v34  ;;  %v2299_v34 = vld [vmem:[%s3441_s1 + $0x2d4] sm:$0xf]  ;;  %v1905_v35 = vld [vmem:[%s3441_s1 + $0x2dc] sm:$0xf0]  ;;  %v1812_v41 = vor.u32 %v2275_v30, %v1809_v33  ;;  %v2296_v48 = vld [vmem:[%s3441_s1 + $0x2bc] sm:$0xf] }
  0x37   :  { %1137 = vmatpush.bf16.msrb.mxu3 %v1584_v40  ;;  %v2001_v39 = vld [vmem:[%s3441_s1 + $0x39c] sm:$0xf0]  ;;  %v2112_v40 = vor.u32 %v2350_v28, %v2109_v29  ;;  %v1908_v42 = vor.u32 %v2299_v34, %v1905_v35  ;;  %v2347_v43 = vld [vmem:[%s3441_s1 + $0x454] sm:$0xf]  ;;  %v1893_v49 = vld [vmem:[%s3441_s1 + $0x2c4] sm:$0xf0] }
  0x38   :  { %1099 = vmatpush.bf16.msrb.mxu0 %v1952_v47  ;;  %v2097_v44 = vld [vmem:[%s3441_s1 + $0x45c] sm:$0xf0]  ;;  %v1797_v47 = vld [vmem:[%s3441_s1 + $0x204] sm:$0xf0]  ;;  %v1896_v54 = vor.u32 %v2296_v48, %v1893_v49  ;;  %v2344_v56 = vld [vmem:[%s3441_s1 + $0x43c] sm:$0xf] }
  0x39   :  { %1112 = vmatpush.bf16.msrb.mxu1 %v2048_v50  ;;  %v2320_v50 = vld [vmem:[%s3441_s1 + $0x37c] sm:$0xf]  ;;  %v2100_v52 = vor.u32 %v2347_v43, %v2097_v44  ;;  %v1800_v53 = vor.u32 %v2272_v45, %v1797_v47  ;;  %v2085_v57 = vld [vmem:[%s3441_s1 + $0x444] sm:$0xf0]  ;;  %v2269_v58 = vld [vmem:[%s3441_s1 + $0x1e4] sm:$0xf] }
  0x3a   :  { %1150 = vmatpush.bf16.msra.mxu2 %v1680_v46  ;;  %v2004_v46 = vor.u32 %v2323_v38, %v2001_v39  ;;  %v1785_v60 = vld [vmem:[%s3441_s1 + $0x1ec] sm:$0xf0]  ;;  %v2293_v61 = vld [vmem:[%s3441_s1 + $0x2a4] sm:$0xf]  ;;  %v2088_v2 = vor.u32 %v2344_v56, %v2085_v57  ;;  %v2266_v7 = vld [vmem:[%s3441_s1 + $0x1cc] sm:$0xf] }
  0x3b   :  { %1138 = vmatpush.bf16.msrb.mxu3 %v1572_v51  ;;  %v1989_v51 = vld [vmem:[%s3441_s1 + $0x384] sm:$0xf0]  ;;  %v1881_v62 = vld [vmem:[%s3441_s1 + $0x2ac] sm:$0xf0]  ;;  %v1788_v3 = vor.u32 %v2269_v58, %v1785_v60  ;;  %v1773_v10 = vld [vmem:[%s3441_s1 + $0x1d4] sm:$0xf0] }
  0x3c   :  { %1100 = vmatpush.bf16.msrb.mxu0 %v1940_v0  ;;  %v1992_v59 = vor.u32 %v2320_v50, %v1989_v51  ;;  %v1977_v0 = vld [vmem:[%s3441_s1 + $0x36c] sm:$0xf0]  ;;  %v1884_v4 = vor.u32 %v2293_v61, %v1881_v62  ;;  %v2290_v11 = vld [vmem:[%s3441_s1 + $0x28c] sm:$0xf]  ;;  %v1869_v12 = vld [vmem:[%s3441_s1 + $0x294] sm:$0xf0] }
  0x3d   :  { %1113 = vmatpush.bf16.msrb.mxu1 %v2036_v5  ;;  %v2341_v5 = vld [vmem:[%s3441_s1 + $0x424] sm:$0xf]  ;;  %v2314_v13 = vld [vmem:[%s3441_s1 + $0x34c] sm:$0xf]  ;;  %v1965_v14 = vld [vmem:[%s3441_s1 + $0x354] sm:$0xf0] }
  0x3e   :  { %1151 = vmatpush.bf16.msra.mxu2 %v1668_v63  ;;  %v2317_v63 = vld [vmem:[%s3441_s1 + $0x364] sm:$0xf]  ;;  %v2338_v19 = vld [vmem:[%s3441_s1 + $0x40c] sm:$0xf]  ;;  %v2061_v20 = vld [vmem:[%s3441_s1 + $0x414] sm:$0xf0] }
  0x3f   :  { %1139 = vmatpush.bf16.msrb.mxu3 %v1560_v6  ;;  %v2073_v6 = vld [vmem:[%s3441_s1 + $0x42c] sm:$0xf0]  ;;  %v1980_v8 = vor.u32 %v2317_v63, %v1977_v0  ;;  %v1761_v23 = vld [vmem:[%s3441_s1 + $0x1bc] sm:$0xf0]  ;;  %v2287_v25 = vld [vmem:[%s3441_s1 + $0x274] sm:$0xf]  ;;  %v2064_v29 = vor.u32 %v2338_v19, %v2061_v20 }
  0x40   :  { %1101 = vmatpush.bf16.msrb.mxu0 %v1928_v18  ;;  %v2076_v16 = vor.u32 %v2341_v5, %v2073_v6  ;;  %v1872_v18 = vor.u32 %v2290_v11, %v1869_v12  ;;  %v1953_v28 = vld [vmem:[%s3441_s1 + $0x33c] sm:$0xf0]  ;;  %v2335_v30 = vld [vmem:[%s3441_s1 + $0x3f4] sm:$0xf]  ;;  %v2260_v35 = vld [vmem:[%s3441_s1 + $0x19c] sm:$0xf] }
  0x41   :  { %1114 = vmatpush.bf16.msrb.mxu1 %v2024_v21  ;;  %v2263_v21 = vld [vmem:[%s3441_s1 + $0x1b4] sm:$0xf]  ;;  %v2049_v34 = vld [vmem:[%s3441_s1 + $0x3fc] sm:$0xf0]  ;;  %v2284_v39 = vld [vmem:[%s3441_s1 + $0x25c] sm:$0xf] }
  0x42   :  { %1152 = vmatpush.bf16.msra.mxu2 %v1656_v17  ;;  %v1776_v17 = vor.u32 %v2266_v7, %v1773_v10 }
  0x43   :  { %1140 = vmatpush.bf16.msrb.mxu3 %v1548_v22  ;;  %1102 = vmatmul.bf16.vlgmr.msrb.gmra.mxu0 %v2879_v32  ;;  %v1968_v22 = vor.u32 %v2314_v13, %v1965_v14 }
  0x44   :  { %1159 = vmatpush.bf16.msra.mxu0 %v1824_v26  ;;  %1115 = vmatmul.bf16.vlgmr.msrb.gmra.mxu1 %v2890_v37  ;;  %v1857_v26 = vld [vmem:[%s3441_s1 + $0x27c] sm:$0xf0] }
  0x45   :  { %1172 = vmatpush.bf16.msra.mxu1 %v1920_v27  ;;  %v2311_v27 = vld [vmem:[%s3441_s1 + $0x334] sm:$0xf]  ;;  %v1860_v33 = vor.u32 %v2287_v25, %v1857_v26 }
  0x46   :  { %1153 = vmatpush.bf16.msra.mxu2 %v1644_v36  ;;  %1141 = vmatmul.bf16.vlgmr.msrb.gmra.mxu3 %v2700_v1  ;;  %v1749_v36 = vld [vmem:[%s3441_s1 + $0x1a4] sm:$0xf0]  ;;  %v1956_v38 = vor.u32 %v2311_v27, %v1953_v28 }
  0x47   :  { %1185 = vmatpush.bf16.msra.mxu3 %v2016_v31  ;;  %v1764_v31 = vor.u32 %v2263_v21, %v1761_v23 }
  0x48   :  { %1160 = vmatpush.bf16.msra.mxu0 %v1812_v41  ;;  %v2308_v41 = vld [vmem:[%s3441_s1 + $0x31c] sm:$0xf] }
  0x49   :  { %1173 = vmatpush.bf16.msra.mxu1 %v1908_v42  ;;  %1154 = vmatmul.bf16.vlgmr.msra.gmra.mxu2 %v2728_v15  ;;  %v1941_v42 = vld [vmem:[%s3441_s1 + $0x324] sm:$0xf0] }
  0x4a   :  { %1198 = vmatpush.bf16.msrb.mxu2 %v2112_v40  ;;  %v1845_v40 = vld [vmem:[%s3441_s1 + $0x264] sm:$0xf0] }
  0x4b   :  { %1186 = vmatpush.bf16.msra.mxu3 %v2004_v46 }
  0x4c   :  { %1161 = vmatpush.bf16.msra.mxu0 %v1800_v53 }
  0x4d   :  { %1174 = vmatpush.bf16.msra.mxu1 %v1896_v54 }
  0x4e   :  { %1199 = vmatpush.bf16.msrb.mxu2 %v2100_v52 }
  0x4f   :  { %1187 = vmatpush.bf16.msra.mxu3 %v1992_v59 }
  0x50   :  { %1162 = vmatpush.bf16.msra.mxu0 %v1788_v3 }
  0x51   :  { %1175 = vmatpush.bf16.msra.mxu1 %v1884_v4 }
  0x52   :  { %1200 = vmatpush.bf16.msrb.mxu2 %v2088_v2 }
  0x53   :  { %1188 = vmatpush.bf16.msra.mxu3 %v1980_v8 }
  0x54   :  { %1163 = vmatpush.bf16.msra.mxu0 %v1776_v17 }
  0x55   :  { %1176 = vmatpush.bf16.msra.mxu1 %v1872_v18 }
  0x56   :  { %1201 = vmatpush.bf16.msrb.mxu2 %v2076_v16 }
  0x57   :  { %1189 = vmatpush.bf16.msra.mxu3 %v1968_v22 }
  0x58   :  { %10 = vsyncpa [#allocation3], 0  ;;  %v2052_v43 = vor.u32 %v2335_v30, %v2049_v34  ;;  %v2332_v44 = vld [vmem:[%s3441_s1 + $0x3dc] sm:$0xf]  ;;  %v2037_v45 = vld [vmem:[%s3441_s1 + $0x3e4] sm:$0xf0]  ;;  %1164 = vmatpush.bf16.msra.mxu0 %v1764_v31  ;;  %v1752_v46 = vor.u32 %v2260_v35, %v1749_v36  ;;  %v1848_v47 = vor.u32 %v2284_v39, %v1845_v40  ;;  %v1944_v51 = vor.u32 %v2308_v41, %v1941_v42 }
  0x59   :  { %1177 = vmatpush.bf16.msra.mxu1 %v1860_v33  ;;  %v2257_v48 = vld [vmem:[%s3441_s1 + $0x184] sm:$0xf]  ;;  %v1737_v49 = vld [vmem:[%s3441_s1 + $0x18c] sm:$0xf0]  ;;  %v2232_v57 = vld [vmem:[%s3441_s1 + $0xb8] sm:$0xf0]  ;;  %v2040_v59 = vor.u32 %v2332_v44, %v2037_v45 }
  0x5a   :  { %1202 = vmatpush.bf16.msrb.mxu2 %v2064_v29  ;;  %v2281_v50 = vld [vmem:[%s3441_s1 + $0x244] sm:$0xf]  ;;  %v1833_v52 = vld [vmem:[%s3441_s1 + $0x24c] sm:$0xf0]  ;;  %v2280_v62 = vld [vmem:[%s3441_s1 + $0x238] sm:$0xf0]  ;;  %v1740_v63 = vor.u32 %v2257_v48, %v1737_v49 }
  0x5b   :  { %1190 = vmatpush.bf16.msra.mxu3 %v1956_v38  ;;  %v2305_v53 = vld [vmem:[%s3441_s1 + $0x304] sm:$0xf]  ;;  %v1929_v54 = vld [vmem:[%s3441_s1 + $0x30c] sm:$0xf0]  ;;  %v1836_v0 = vor.u32 %v2281_v50, %v1833_v52  ;;  %v2256_v8 = vld [vmem:[%s3441_s1 + $0x178] sm:$0xf0] }
  0x5c   :  { %v1635_v56 = vld [vmem:[%s3441_s1 + $0xb0] sm:$0xf]  ;;  %v2353_v58 = vld [vmem:[%s3441_s1 + $0x484] sm:$0xf]  ;;  %1165 = vmatpush.bf16.msra.mxu0 %v1752_v46  ;;  %v1932_v4 = vor.u32 %v2305_v53, %v1929_v54  ;;  %v1623_v10 = vld [vmem:[%s3441_s1 + $0x98] sm:$0xf] }
  0x5d   :  { %v2121_v60 = vld [vmem:[%s3441_s1 + $0x48c] sm:$0xf0]  ;;  %1178 = vmatpush.bf16.msra.mxu1 %v1848_v47  ;;  %v2329_v2 = vld [vmem:[%s3441_s1 + $0x3c4] sm:$0xf]  ;;  %v1636_v5 = vor.u32 %v2232_v57, %v1635_v56  ;;  %v1815_v14 = vld [vmem:[%s3441_s1 + $0x218] sm:$0xf] }
  0x5e   :  { %1203 = vmatpush.bf16.msrb.mxu2 %v2052_v43  ;;  %v1827_v61 = vld [vmem:[%s3441_s1 + $0x230] sm:$0xf]  ;;  %v2124_v7 = vor.u32 %v2353_v58, %v2121_v60  ;;  %v2229_v11 = vld [vmem:[%s3441_s1 + $0xa0] sm:$0xf0]  ;;  %v2304_v18 = vld [vmem:[%s3441_s1 + $0x2f8] sm:$0xf0] }
  0x5f   :  { %v2025_v3 = vld [vmem:[%s3441_s1 + $0x3cc] sm:$0xf0]  ;;  %1191 = vmatpush.bf16.msra.mxu3 %v1944_v51  ;;  %v1828_v12 = vor.u32 %v2280_v62, %v1827_v61  ;;  %v2277_v16 = vld [vmem:[%s3441_s1 + $0x220] sm:$0xf0]  ;;  %v1624_v20 = vor.u32 %v2229_v11, %v1623_v10  ;;  %v1719_v21 = vld [vmem:[%s3441_s1 + $0x158] sm:$0xf] }
  0x60   :  { %v1731_v6 = vld [vmem:[%s3441_s1 + $0x170] sm:$0xf]  ;;  %v2028_v13 = vor.u32 %v2329_v2, %v2025_v3  ;;  %1166 = vmatpush.bf16.msra.mxu0 %v1740_v63  ;;  %v2253_v22 = vld [vmem:[%s3441_s1 + $0x160] sm:$0xf0]  ;;  %v1611_v23 = vld [vmem:[%s3441_s1 + $0x80] sm:$0xf]  ;;  %v1816_v26 = vor.u32 %v2277_v16, %v1815_v14 }
  0x61   :  { %1179 = vmatpush.bf16.msra.mxu1 %v1836_v0  ;;  %v1923_v17 = vld [vmem:[%s3441_s1 + $0x2f0] sm:$0xf]  ;;  %v1732_v19 = vor.u32 %v2256_v8, %v1731_v6  ;;  %v2226_v25 = vld [vmem:[%s3441_s1 + $0x88] sm:$0xf0]  ;;  %v1803_v28 = vld [vmem:[%s3441_s1 + $0x200] sm:$0xf]  ;;  %v1720_v33 = vor.u32 %v2253_v22, %v1719_v21 }
  0x62   :  { %1204 = vmatpush.bf16.msrb.mxu2 %v2040_v59  ;;  %v1924_v27 = vor.u32 %v2304_v18, %v1923_v17  ;;  %v2274_v29 = vld [vmem:[%s3441_s1 + $0x208] sm:$0xf0]  ;;  %v1911_v30 = vld [vmem:[%s3441_s1 + $0x2d8] sm:$0xf]  ;;  %v2301_v31 = vld [vmem:[%s3441_s1 + $0x2e0] sm:$0xf0]  ;;  %v1612_v34 = vor.u32 %v2226_v25, %v1611_v23 }
  0x63   :  { %1192 = vmatpush.bf16.msra.mxu3 %v1932_v4  ;;  %1167 = vmatmul.bf16.vlgmr.msra.gmra.mxu0 %v2686_v55  ;;  %v1707_v35 = vld [vmem:[%s3441_s1 + $0x140] sm:$0xf]  ;;  %v2250_v36 = vld [vmem:[%s3441_s1 + $0x148] sm:$0xf0]  ;;  %v1599_v38 = vld [vmem:[%s3441_s1 + $0x68] sm:$0xf]  ;;  %v1804_v40 = vor.u32 %v2274_v29, %v1803_v28  ;;  %v1912_v41 = vor.u32 %v2301_v31, %v1911_v30 }
  0x64   :  { %1250 = vmatpush.bf16.msrb.mxu0 %v1828_v12  ;;  %1180 = vmatmul.bf16.vlgmr.msra.gmra.mxu1 %v2746_v24  ;;  %v2223_v39 = vld [vmem:[%s3441_s1 + $0x70] sm:$0xf0]  ;;  %v1791_v42 = vld [vmem:[%s3441_s1 + $0x1e8] sm:$0xf]  ;;  %v1899_v44 = vld [vmem:[%s3441_s1 + $0x2c0] sm:$0xf]  ;;  %v1708_v46 = vor.u32 %v2250_v36, %v1707_v35 }
  0x65   :  { %1224 = vmatpush.bf16.msrb.mxu1 %v1636_v5  ;;  %v2271_v43 = vld [vmem:[%s3441_s1 + $0x1f0] sm:$0xf0]  ;;  %v2298_v45 = vld [vmem:[%s3441_s1 + $0x2c8] sm:$0xf0]  ;;  %v1600_v47 = vor.u32 %v2223_v39, %v1599_v38  ;;  %v1695_v48 = vld [vmem:[%s3441_s1 + $0x128] sm:$0xf] }
  0x66   :  { %1205 = vmatpush.bf16.msrb.mxu2 %v2028_v13  ;;  %1193 = vmatmul.bf16.vlgmr.msra.gmra.mxu3 %v2879_v32  ;;  %v2247_v49 = vld [vmem:[%s3441_s1 + $0x130] sm:$0xf0]  ;;  %v1587_v50 = vld [vmem:[%s3441_s1 + $0x50] sm:$0xf]  ;;  %v2220_v51 = vld [vmem:[%s3441_s1 + $0x58] sm:$0xf0]  ;;  %v1792_v52 = vor.u32 %v2271_v43, %v1791_v42  ;;  %v1900_v53 = vor.u32 %v2298_v45, %v1899_v44 }
  0x67   :  { %1218 = vmatpush.bf16.msrb.mxu3 %v2124_v7  ;;  %v1779_v54 = vld [vmem:[%s3441_s1 + $0x1d0] sm:$0xf]  ;;  %v2268_v56 = vld [vmem:[%s3441_s1 + $0x1d8] sm:$0xf0]  ;;  %v1887_v57 = vld [vmem:[%s3441_s1 + $0x2a8] sm:$0xf]  ;;  %v1696_v59 = vor.u32 %v2247_v49, %v1695_v48  ;;  %v1588_v60 = vor.u32 %v2220_v51, %v1587_v50 }
  0x68   :  { %1251 = vmatpush.bf16.msrb.mxu0 %v1816_v26  ;;  %v2295_v58 = vld [vmem:[%s3441_s1 + $0x2b0] sm:$0xf0]  ;;  %v1683_v61 = vld [vmem:[%s3441_s1 + $0x110] sm:$0xf]  ;;  %v2244_v62 = vld [vmem:[%s3441_s1 + $0x118] sm:$0xf0]  ;;  %v1780_v2 = vor.u32 %v2268_v56, %v1779_v54 }
  0x69   :  { %1225 = vmatpush.bf16.msrb.mxu1 %v1624_v20  ;;  %1206 = vmatmul.bf16.vlgmr.msrb.gmra.mxu2 %v2890_v37  ;;  %v1575_v63 = vld [vmem:[%s3441_s1 + $0x38] sm:$0xf]  ;;  %v2217_v0 = vld [vmem:[%s3441_s1 + $0x40] sm:$0xf0]  ;;  %v1888_v3 = vor.u32 %v2295_v58, %v1887_v57  ;;  %v1875_v6 = vld [vmem:[%s3441_s1 + $0x290] sm:$0xf]  ;;  %v1684_v8 = vor.u32 %v2244_v62, %v1683_v61 }
  0x6a   :  { %1263 = vmatpush.bf16.msra.mxu2 %v1924_v27  ;;  %v1767_v4 = vld [vmem:[%s3441_s1 + $0x1b8] sm:$0xf]  ;;  %v2265_v5 = vld [vmem:[%s3441_s1 + $0x1c0] sm:$0xf0]  ;;  %v2292_v7 = vld [vmem:[%s3441_s1 + $0x298] sm:$0xf0]  ;;  %v1576_v10 = vor.u32 %v2217_v0, %v1575_v63 }
  0x6b   :  { %1237 = vmatpush.bf16.msra.mxu3 %v1732_v19  ;;  %v1671_v11 = vld [vmem:[%s3441_s1 + $0xf8] sm:$0xf]  ;;  %v2241_v12 = vld [vmem:[%s3441_s1 + $0x100] sm:$0xf0]  ;;  %v1563_v13 = vld [vmem:[%s3441_s1 + $0x20] sm:$0xf]  ;;  %v1768_v16 = vor.u32 %v2265_v5, %v1767_v4  ;;  %v1876_v17 = vor.u32 %v2292_v7, %v1875_v6 }
  0x6c   :  { %1252 = vmatpush.bf16.msrb.mxu0 %v1804_v40  ;;  %v2214_v14 = vld [vmem:[%s3441_s1 + $0x28] sm:$0xf0]  ;;  %v1755_v18 = vld [vmem:[%s3441_s1 + $0x1a0] sm:$0xf]  ;;  %v1863_v20 = vld [vmem:[%s3441_s1 + $0x278] sm:$0xf]  ;;  %v1672_v22 = vor.u32 %v2241_v12, %v1671_v11 }
  0x6d   :  { %1226 = vmatpush.bf16.msrb.mxu1 %v1612_v34  ;;  %v2262_v19 = vld [vmem:[%s3441_s1 + $0x1a8] sm:$0xf0]  ;;  %v2289_v21 = vld [vmem:[%s3441_s1 + $0x280] sm:$0xf0]  ;;  %v1564_v23 = vor.u32 %v2214_v14, %v1563_v13  ;;  %v1659_v25 = vld [vmem:[%s3441_s1 + $0xe0] sm:$0xf] }
  0x6e   :  { %1264 = vmatpush.bf16.msra.mxu2 %v1912_v41  ;;  %v2238_v26 = vld [vmem:[%s3441_s1 + $0xe8] sm:$0xf0]  ;;  %v1551_v27 = vld [vmem:[%s3441_s1 + $0x8] sm:$0xf]  ;;  %v2211_v28 = vld [vmem:[%s3441_s1 + $0x10] sm:$0xf0]  ;;  %v1756_v31 = vor.u32 %v2262_v19, %v1755_v18 }
  0x6f   :  { %1238 = vmatpush.bf16.msra.mxu3 %v1720_v33  ;;  %v2019_v29 = vld [vmem:[%s3441_s1 + $0x3b0] sm:$0xf]  ;;  %v2328_v30 = vld [vmem:[%s3441_s1 + $0x3b8] sm:$0xf0]  ;;  %v1864_v33 = vor.u32 %v2289_v21, %v1863_v20  ;;  %v1743_v34 = vld [vmem:[%s3441_s1 + $0x188] sm:$0xf]  ;;  %v1660_v41 = vor.u32 %v2238_v26, %v1659_v25  ;;  %v1552_v42 = vor.u32 %v2211_v28, %v1551_v27 }
  0x70   :  { %1253 = vmatpush.bf16.msrb.mxu0 %v1792_v52  ;;  %v2259_v35 = vld [vmem:[%s3441_s1 + $0x190] sm:$0xf0]  ;;  %v1851_v36 = vld [vmem:[%s3441_s1 + $0x260] sm:$0xf]  ;;  %v2286_v38 = vld [vmem:[%s3441_s1 + $0x268] sm:$0xf0]  ;;  %v2020_v43 = vor.u32 %v2328_v30, %v2019_v29 }
  0x71   :  { %1227 = vmatpush.bf16.msrb.mxu1 %v1600_v47  ;;  %v2127_v39 = vld [vmem:[%s3441_s1 + $0x488] sm:$0xf]  ;;  %v2355_v40 = vld [vmem:[%s3441_s1 + $0x490] sm:$0xf0]  ;;  %v1744_v47 = vor.u32 %v2259_v35, %v1743_v34  ;;  %v2352_v48 = vld [vmem:[%s3441_s1 + $0x478] sm:$0xf0]  ;;  %v1852_v51 = vor.u32 %v2286_v38, %v1851_v36 }
  0x72   :  { %1265 = vmatpush.bf16.msra.mxu2 %v1900_v53  ;;  %v1647_v44 = vld [vmem:[%s3441_s1 + $0xc8] sm:$0xf]  ;;  %v2235_v45 = vld [vmem:[%s3441_s1 + $0xd0] sm:$0xf0]  ;;  %v2007_v49 = vld [vmem:[%s3441_s1 + $0x398] sm:$0xf]  ;;  %v2128_v52 = vor.u32 %v2355_v40, %v2127_v39 }
  0x73   :  { %1239 = vmatpush.bf16.msra.mxu3 %v1708_v46  ;;  %v2115_v46 = vld [vmem:[%s3441_s1 + $0x470] sm:$0xf]  ;;  %v2325_v50 = vld [vmem:[%s3441_s1 + $0x3a0] sm:$0xf0]  ;;  %v1839_v53 = vld [vmem:[%s3441_s1 + $0x248] sm:$0xf]  ;;  %v1648_v56 = vor.u32 %v2235_v45, %v1647_v44 }
  0x74   :  { %1254 = vmatpush.bf16.msrb.mxu0 %v1780_v2  ;;  %v2283_v54 = vld [vmem:[%s3441_s1 + $0x250] sm:$0xf0]  ;;  %v2116_v57 = vor.u32 %v2352_v48, %v2115_v46  ;;  %v2008_v58 = vor.u32 %v2325_v50, %v2007_v49  ;;  %v1995_v61 = vld [vmem:[%s3441_s1 + $0x380] sm:$0xf]  ;;  %v2322_v62 = vld [vmem:[%s3441_s1 + $0x388] sm:$0xf0] }
  0x75   :  { %1228 = vmatpush.bf16.msrb.mxu1 %v1588_v60  ;;  %v2349_v60 = vld [vmem:[%s3441_s1 + $0x460] sm:$0xf0]  ;;  %v1840_v63 = vor.u32 %v2283_v54, %v1839_v53  ;;  %v1996_v2 = vor.u32 %v2322_v62, %v1995_v61  ;;  %v2346_v4 = vld [vmem:[%s3441_s1 + $0x448] sm:$0xf0]  ;;  %v1983_v5 = vld [vmem:[%s3441_s1 + $0x368] sm:$0xf] }
  0x76   :  { %1266 = vmatpush.bf16.msra.mxu2 %v1888_v3  ;;  %2130 = vmatmul.msk.bf16.vlgmr.msrb.gmra.mxu3 %vm1038_vm0, %v2842_v9  ;;  %v2091_v3 = vld [vmem:[%s3441_s1 + $0x440] sm:$0xf]  ;;  %v2079_v7 = vld [vmem:[%s3441_s1 + $0x428] sm:$0xf]  ;;  %v2363_v11 = vld [vmem:[%s3443_s3 + $0x38] sm:$0xff]  ;;  %vm1480_vm1 = vcmask 1045504  }
  0x77   :  { %1240 = vmatpush.bf16.msra.mxu3 %v1696_v59  ;;  %v2103_v59 = vld [vmem:[%s3441_s1 + $0x458] sm:$0xf]  ;;  %v2067_v14 = vld [vmem:[%s3441_s1 + $0x410] sm:$0xf]  ;;  %v2310_v25 = vld [vmem:[%s3441_s1 + $0x328] sm:$0xf0] }
  0x78   :  { %1255 = vmatpush.bf16.msrb.mxu0 %v1768_v16  ;;  %v2104_v0 = vor.u32 %v2349_v60, %v2103_v59  ;;  %v2340_v16 = vld [vmem:[%s3441_s1 + $0x418] sm:$0xf0]  ;;  %v2362_v18 = vld [vmem:[%s3443_s3 + $0x30] sm:$0xff]  ;;  %v2055_v21 = vld [vmem:[%s3441_s1 + $0x3f8] sm:$0xf]  ;;  %vm1476_vm2 = vcmask 359424  }
  0x79   :  { %1229 = vmatpush.bf16.msrb.mxu1 %v1576_v10  ;;  %v1971_v10 = vld [vmem:[%s3441_s1 + $0x350] sm:$0xf]  ;;  %v2068_v19 = vor.u32 %v2340_v16, %v2067_v14  ;;  %v2361_v26 = vld [vmem:[%s3443_s3 + $0x28] sm:$0xff]  ;;  %v2043_v29 = vld [vmem:[%s3441_s1 + $0x3e0] sm:$0xf]  ;;  %s2409_s9 = smov [#allocation2]  }
  0x7a   :  { %1267 = vmatpush.bf16.msra.mxu2 %v1876_v17  ;;  %v2313_v17 = vld [vmem:[%s3441_s1 + $0x340] sm:$0xf0]  ;;  %v2334_v30 = vld [vmem:[%s3441_s1 + $0x3e8] sm:$0xf0]  ;;  %v2031_v36 = vld [vmem:[%s3441_s1 + $0x3c8] sm:$0xf] }
  0x7b   :  { %1241 = vmatpush.bf16.msra.mxu3 %v1684_v8  ;;  %v2343_v8 = vld [vmem:[%s3441_s1 + $0x430] sm:$0xf0]  ;;  %v2044_v34 = vor.u32 %v2334_v30, %v2043_v29  ;;  %v2359_v40 = vld [vmem:[%s3443_s3 + $0x18] sm:$0xff]  ;;  %v2357_v44 = vld [vmem:[%s3443_s3 + $0x8] sm:$0xff]  ;;  %s1530_s10 = sshll.u32 %s2409_s9, 4  ;;  %s1532_s12 = sshll.u32 %s3445_s5, 4  ;;  %s1531_s10 = int_to_ptr.vmem [resolvable:$true] %s1530_s10  ;;  %s1533_s12 = int_to_ptr.hbm [resolvable:$true] %s1532_s12 }
  0x7c   :  { %1256 = vmatpush.bf16.msrb.mxu0 %v1756_v31  ;;  %v2080_v12 = vor.u32 %v2343_v8, %v2079_v7  ;;  %v1935_v31 = vld [vmem:[%s3441_s1 + $0x308] sm:$0xf]  ;;  %v2331_v38 = vld [vmem:[%s3441_s1 + $0x3d0] sm:$0xf0]  ;;  %v2367_v8 = vld [vmem:[%s3443_s3 + $0x58] sm:$0xff]  ;;  %vm1523_vm3 = vcmask 320512  }
  0x7d   :  { %1230 = vmatpush.bf16.msrb.mxu1 %v1564_v23  ;;  %v1947_v23 = vld [vmem:[%s3441_s1 + $0x320] sm:$0xf]  ;;  %v2032_v39 = vor.u32 %v2331_v38, %v2031_v36 }
  0x7e   :  { %1268 = vmatpush.bf16.msra.mxu2 %v1864_v33  ;;  %v1948_v28 = vor.u32 %v2310_v25, %v1947_v23  ;;  %v2360_v33 = vld [vmem:[%s3443_s3 + $0x20] sm:$0xff] }
  0x7f   :  { %1242 = vmatpush.bf16.msra.mxu3 %v1672_v22  ;;  %v2337_v22 = vld [vmem:[%s3441_s1 + $0x400] sm:$0xf0] }
  0x80   :  { %1257 = vmatpush.bf16.msrb.mxu0 %v1744_v47  ;;  %v2056_v27 = vor.u32 %v2337_v22, %v2055_v21  ;;  %v2356_v47 = vld [vmem:[%s3443_s3] sm:$0xff] }
  0x81   :  { %1231 = vmatpush.bf16.msrb.mxu1 %v1552_v42  ;;  %v2358_v42 = vld [vmem:[%s3443_s3 + $0x10] sm:$0xff]  ;;  %v2364_v14 = vld [vmem:[%s3443_s3 + $0x40] sm:$0xff] }
  0x82   :  { %1269 = vmatpush.bf16.msra.mxu2 %v1852_v51 }
  0x83   :  { %1243 = vmatpush.bf16.msra.mxu3 %v1660_v41  ;;  %1258 = vmatmul.bf16.vlgmr.msrb.gmra.mxu0 %v2686_v55  ;;  %v2319_v55 = vld [vmem:[%s3441_s1 + $0x370] sm:$0xf0] }
  0x84   :  { %1309 = vmatpush.bf16.msra.mxu0 %v2128_v52  ;;  %1232 = vmatmul.bf16.vlgmr.msrb.gmra.mxu1 %v2700_v1  ;;  %v2092_v1 = vor.u32 %v2346_v4, %v2091_v3  ;;  %v1984_v6 = vor.u32 %v2319_v55, %v1983_v5  ;;  %v2369_v4 = vld [vmem:[%s3443_s3 + $0x68] sm:$0xff] }
  0x85   :  { %1276 = vmatpush.bf16.msra.mxu1 %v2020_v43 }
  0x86   :  { %1270 = vmatpush.bf16.msra.mxu2 %v1840_v63  ;;  %v2370_v63 = vld [vmem:[%s3443_s3 + $0x70] sm:$0xff] }
  0x87   :  { %1244 = vmatpush.bf16.msra.mxu3 %v1648_v56 }
  0x89   :  { %1277 = vmatpush.bf16.msra.mxu1 %v2008_v58  ;;  %1271 = vmatmul.bf16.vlgmr.msra.gmra.mxu2 %v2746_v24  ;;  %v1959_v24 = vld [vmem:[%s3441_s1 + $0x338] sm:$0xf] }
  0x8a   :  { %1245 = vmatmul.bf16.vlgmr.msra.gmra.mxu3 %v2728_v15  ;;  %v2316_v15 = vld [vmem:[%s3441_s1 + $0x358] sm:$0xf0]  ;;  %1484 = vmatpush.bf16.msrb.mxu2 %v2363_v11  ;;  %v1960_v20 = vor.u32 %v2313_v17, %v1959_v24  ;;  %v2366_v11 = vld [vmem:[%s3443_s3 + $0x50] sm:$0xff] }
  0x8b   :  { %1289 = vmatpush.bf16.msrb.mxu3 %v2116_v57  ;;  %v1972_v13 = vor.u32 %v2316_v15, %v1971_v10  ;;  %v2371_v58 = vld [vmem:[%s3443_s3 + $0x78] sm:$0xff] }
  0x8c   :  { %1497 = vmatpush.bf16.msrb.mxu0 %v2371_v58 }
  0x8d   :  { %1278 = vmatpush.bf16.msra.mxu1 %v1996_v2 }
  0x8e   :  { %1485 = vmatpush.bf16.msrb.mxu2 %v2362_v18 }
  0x8f   :  { %1290 = vmatpush.bf16.msrb.mxu3 %v2104_v0 }
  0x90   :  { %1498 = vmatpush.bf16.msrb.mxu0 %v2370_v63 }
  0x91   :  { %1279 = vmatpush.bf16.msra.mxu1 %v1984_v6 }
  0x92   :  { %1486 = vmatpush.bf16.msrb.mxu2 %v2361_v26 }
  0x93   :  { %1291 = vmatpush.bf16.msrb.mxu3 %v2092_v1  ;;  %2131 = vmatmul.msk.bf16.vlgmr.msra.gmra.mxu0 %vm1038_vm0, %v2842_v9  ;;  %v2307_v9 = vld [vmem:[%s3441_s1 + $0x310] sm:$0xf0]  ;;  %v2368_v1 = vld [vmem:[%s3443_s3 + $0x60] sm:$0xff] }
  0x94   :  { %v1936_v35 = vor.u32 %v2307_v9, %v1935_v31  ;;  %1499 = vmatpush.bf16.msrb.mxu0 %v2369_v4 }
  0x95   :  { %1280 = vmatpush.bf16.msra.mxu1 %v1972_v13 }
  0x96   :  { %1487 = vmatpush.bf16.msrb.mxu2 %v2360_v33  ;;  %v2206_v33 = vld [vmem:[%s3443_s3 + $0x90] sm:$0xf] }
  0x97   :  { %1292 = vmatpush.bf16.msrb.mxu3 %v2080_v12  ;;  %v2365_v12 = vld [vmem:[%s3443_s3 + $0x48] sm:$0xff] }
  0x98   :  { %1500 = vmatpush.bf16.msrb.mxu0 %v2368_v1  ;;  %v2376_v1 = vld [vmem:[%s3444_s4] ss:$0 sm:$0xff] }
  0x99   :  { %1281 = vmatpush.bf16.msra.mxu1 %v1960_v20 }
  0x9a   :  { %1488 = vmatpush.bf16.msrb.mxu2 %v2359_v40 }
  0x9b   :  { %1293 = vmatpush.bf16.msrb.mxu3 %v2068_v19 }
  0x9c   :  { %1501 = vmatpush.bf16.msrb.mxu0 %v2367_v8 }
  0x9d   :  { %1282 = vmatpush.bf16.msra.mxu1 %v1948_v28 }
  0x9e   :  { %1489 = vmatpush.bf16.msrb.mxu2 %v2358_v42 }
  0x9f   :  { %1294 = vmatpush.bf16.msrb.mxu3 %v2056_v27 }
  0xa0   :  { %v1051_v41 = vpop.f32.mrf.mxu0  ;;  %1502 = vmatpush.bf16.msrb.mxu0 %v2366_v11 }
  0xa1   :  { %1283 = vmatpush.bf16.msra.mxu1 %v1936_v35  ;;  %v1064_v43 = vpop.f32.mrf.mxu1 }
  0xa2   :  { %1490 = vmatpush.bf16.msrb.mxu2 %v2357_v44 }
  0xa3   :  { %1295 = vmatpush.bf16.msrb.mxu3 %v2044_v34  ;;  %v2374_v34 = vld [vmem:[%s3443_s3 + $0x90] sm:$0x30] }
  0xa4   :  { %1284 = vmatmul.bf16.vlgmr.msra.gmra.mxu1 %v2879_v32  ;;  %v3390_v32 = vld [vmem:[%s3442_s2] sm:$0x7]  ;;  %1503 = vmatpush.bf16.msrb.mxu0 %v2365_v12  ;;  %v2207_v35 = vor.u32 %v2374_v34, %v2206_v33 }
  0xa5   :  { %v248_v46 = vperm.slane %v3390_v32, 0  ;;  %v249_v17 = vperm.slane %v3390_v32, 1 }
  0xa6   :  { %1491 = vmatpush.bf16.msrb.mxu2 %v2356_v47  ;;  %v2372_v47 = vld [vmem:[%s3443_s3 + $0x80] sm:$0xff] }
  0xa7   :  { %1296 = vmatpush.bf16.msrb.mxu3 %v2032_v39  ;;  %v1052_v49 = vadd.f32 %v1051_v41, %v248_v46  ;;  %v1482_v39 = vsel %vm1480_vm1, %v2207_v35, 0 }
  0xa8   :  { %v1053_v45 = vpop.f32.mrf.mxu0  ;;  %1504 = vmatpush.bf16.msrb.mxu0 %v2364_v14  ;;  %1515 = vmatpush.bf16.msrb.mxu1 %v1482_v39 }
  0xa9   :  { %v1066_v48 = vpop.f32.mrf.mxu1  ;;  %v1090_v50 = vpop.f32.mrf.mxu3  ;;  %v1065_v52 = vadd.f32 %v1064_v43, %v1052_v49  ;;  %v2373_v45 = vld [vmem:[%s3443_s3 + $0x88] sm:$0xff]  ;;  %v250_v49 = vperm.slane %v3390_v32, 2 }
  0xaa   :  { %1297 = vmatmul.bf16.vlgmr.msrb.gmra.mxu3 %v2890_v37  ;;  %v1077_v37 = vpop.f32.mrf.mxu2 }
  0xab   :  { %v1078_v53 = vadd.f32 %v1077_v37, %v1065_v52 }
  0xac   :  { %1516 = vmatpush.bf16.msrb.mxu1 %v2373_v45 }
  0xad   :  { %v1091_v56 = vadd.f32 %v1090_v50, %v1078_v53 }
  0xb0   :  { %1517 = vmatpush.bf16.msrb.mxu1 %v2372_v47 }
  0xb1   :  { %v1092_v54 = vpop.f32.mrf.mxu3 }
  0xb2   :  { %v1079_v51 = vpop.f32.mrf.mxu2 }
  0xba   :  { %v1129_v61 = vpop.f32.mrf.mxu2 }
  0xc0   :  { %v1103_v57 = vpop.f32.mrf.mxu0 }
  0xc1   :  { %v1104_v59 = vadd.f32 %v1103_v57, %v1091_v56  ;;  %v1116_v60 = vpop.f32.mrf.mxu1 }
  0xc2   :  { %v1131_v5 = vpop.f32.mrf.mxu2 }
  0xc3   :  { %v1117_v62 = vadd.f32 %v1116_v60, %v1104_v59 }
  0xc5   :  { %v1130_v0 = vadd.f32 %v1129_v61, %v1117_v62 }
  0xc7   :  { %2377 = vtanh.f32 %v1130_v0 }
  0xc8   :  { %v1105_v3 = vpop.f32.mrf.mxu0 }
  0xc9   :  { %v1142_v2 = vpop.f32.mrf.mxu3  ;;  %v1118_v55 = vpop.f32.mrf.mxu1 }
  0xca   :  { %v1143_v18 = vadd.f32 %v1142_v2, %v249_v17 }
  0xcc   :  { %v1155_v15 = vpop.f32.mrf.mxu2 }
  0xcd   :  { %v2378_v6 = vpop.eup %2377  ;;  %v1156_v23 = vadd.f32 %v1155_v15, %v1143_v18 }
  0xce   :  { %v1318_v7 = vpack.c.bf16 %v2378_v6, %v2378_v6 }
  0xd0   :  { %1492 = vmatmul.bf16.vlgmr.msrb.gmra.mxu2 %v1318_v7 }
  0xd1   :  { %v1144_v10 = vpop.f32.mrf.mxu3 }
  0xd4   :  { %v1157_v13 = vpop.f32.mrf.mxu2 }
  0xe0   :  { %v1168_v16 = vpop.f32.mrf.mxu0 }
  0xe1   :  { %v1181_v24 = vpop.f32.mrf.mxu1  ;;  %v1169_v25 = vadd.f32 %v1168_v16, %v1156_v23 }
  0xe3   :  { %v1182_v27 = vadd.f32 %v1181_v24, %v1169_v25 }
  0xe8   :  { %v1170_v20 = vpop.f32.mrf.mxu0 }
  0xe9   :  { %v1194_v19 = vpop.f32.mrf.mxu3  ;;  %v1183_v22 = vpop.f32.mrf.mxu1 }
  0xea   :  { %v1195_v29 = vadd.f32 %v1194_v19, %v1182_v27 }
  0xec   :  { %v1207_v21 = vpop.f32.mrf.mxu2 }
  0xed   :  { %v1208_v30 = vadd.f32 %v1207_v21, %v1195_v29 }
  0xf1   :  { %v1196_v26 = vpop.f32.mrf.mxu3 }
  0xf4   :  { %v1209_v28 = vpop.f32.mrf.mxu2 }
  0xf9   :  { %v1220_v31 = vpop.f32.mrf.mxu3 }
  0xfa   :  { %v1221_v9 = vadd.f32 %v1220_v31, %v1208_v30 }
  0xfc   :  { %2379 = vtanh.f32 %v1221_v9 }
 0x100   :  { %v1259_v38 = vpop.f32.mrf.mxu0 }
 0x101   :  { %v1233_v36 = vpop.f32.mrf.mxu1  ;;  %v1222_v40 = vpop.f32.mrf.mxu3 }
 0x102   :  { %v2380_v41 = vpop.eup %2379  ;;  %v1234_v52 = vadd.f32 %v1233_v36, %v250_v49 }
 0x103   :  { %v1319_v42 = vpack.c.bf16 %v2380_v41, %v2380_v41 }
 0x105   :  { %1505 = vmatmul.bf16.vlgmr.msrb.gmra.mxu0 %v1319_v42 }
 0x108   :  { %v1261_v44 = vpop.f32.mrf.mxu0 }
 0x109   :  { %v1235_v43 = vpop.f32.mrf.mxu1 }
 0x10c   :  { %v1272_v46 = vpop.f32.mrf.mxu2 }
 0x10d   :  { %v1246_v37 = vpop.f32.mrf.mxu3 }
 0x10e   :  { %v1247_v54 = vadd.f32 %v1246_v37, %v1234_v52 }
 0x110   :  { %v1311_v48 = vpop.f32.mrf.mxu0  ;;  %v1260_v57 = vadd.f32 %v1259_v38, %v1247_v54 }
 0x112   :  { %v1273_v58 = vadd.f32 %v1272_v46, %v1260_v57 }
 0x114   :  { %v1274_v51 = vpop.f32.mrf.mxu2 }
 0x115   :  { %v1248_v50 = vpop.f32.mrf.mxu3 }
 0x118   :  { %v1313_v53 = vpop.f32.mrf.mxu0 }
 0x121   :  { %v1285_v56 = vpop.f32.mrf.mxu1 }
 0x122   :  { %v1286_v60 = vadd.f32 %v1285_v56, %v1273_v58 }
 0x129   :  { %v1287_v59 = vpop.f32.mrf.mxu1 }
 0x12d   :  { %v1298_v61 = vpop.f32.mrf.mxu3 }
 0x12e   :  { %v1299_v62 = vadd.f32 %v1298_v61, %v1286_v60 }
 0x130   :  { %v1312_v63 = vadd.f32 %v1311_v48, %v1299_v62 }
 0x132   :  { %2381 = vtanh.f32 %v1312_v63 }
 0x135   :  { %v1300_v0 = vpop.f32.mrf.mxu3 }
 0x138   :  { %v2382_v2 = vpop.eup %2381 }
 0x139   :  { %v1320_v3 = vpack.c.bf16 %v2382_v2, %v2382_v2 }
 0x13b   :  { %2208 = vmatmul.msk.bf16.vlgmr.msrb.gmra.mxu1 %vm1476_vm2, %v1320_v3 }
 0x153   :  { %v1493_v32 = vpop.f32.mrf.mxu2 }
 0x154   :  { %v1494_v6 = vadd.f32 %v2376_v1, %v1493_v32 }
 0x15b   :  { %v1495_v4 = vpop.f32.mrf.mxu2 }
 0x182   :  { %v1506_v5 = vpop.f32.mrf.mxu0 }
 0x183   :  { %v1507_v7 = vadd.f32 %v1506_v5, %v1494_v6 }
 0x18a   :  { %v1508_v55 = vpop.f32.mrf.mxu0 }
 0x1b8   :  { %v1519_v8 = vpop.f32.mrf.mxu1 }
 0x1b9   :  { %v1520_v10 = vadd.f32 %v1519_v8, %v1507_v7 }
 0x1bb   :  { %1524 = vst.msk [vmem:[#allocation2] sm:$0x3] %vm1523_vm3, %v1520_v10 }
 0x1bc   :  { %1535 = dma.vmem_to_hbm [thread:$0]  %s1531_s10, 32, %s1533_s12, [#allocation3]  }
 0x1c0   :  { %v1521_v15 = vpop.f32.mrf.mxu1 }
 0x1c1   :  { %2407 = dma.done.wait [#allocation3], 32  }
 0x1c2   :  { %2408 = vsyncadd [#allocation3], 4294967264 }
 0x1c3   :  { %1540 = vsyncpa [#allocation3], 1 }

</bundles_post_ra>
